<compile_context>
chip_gen: v6e
topology: v6e:2x2x1
jax: 0.10.0
libtpu: 0.0.40
codegen_flags: <defaults>
</compile_context>

<pallas_src>
import jax
import jax.numpy as jnp
from jax.experimental import pallas as pl
from jax.experimental.pallas import tpu as pltpu


def _round_up(a, b):
    return ((a + b - 1) // b) * b


def _mlp_encoder_kernel(x_ref, w1_ref, b1_ref, w2_ref, b2_ref, w3_ref, b3_ref, o_ref):
    # layer 1: Linear(seqlen -> 64) + ReLU
    h = jnp.dot(x_ref[...], w1_ref[...], preferred_element_type=jnp.float32) + b1_ref[...]
    h = jnp.maximum(h, 0.0)
    # layer 2: Linear(64 -> 64) + ReLU
    h = jnp.dot(h, w2_ref[...], preferred_element_type=jnp.float32) + b2_ref[...]
    h = jnp.maximum(h, 0.0)
    # layer 3: Linear(64 -> z_dim_padded), no activation (padded cols are exact zeros)
    out = jnp.dot(h, w3_ref[...], preferred_element_type=jnp.float32) + b3_ref[...]
    o_ref[...] = out.astype(o_ref.dtype)


def mlp_encoder(x2d, w1, b1, w2, b2, w3, b3, *, tm_max=512):
    """x2d: [N, seqlen] float32. Returns [N, z_dim] float32."""
    N, seqlen = x2d.shape
    hid = w1.shape[1]
    z_dim = w3.shape[1]

    # ---- lane-dense output: pad last layer to a multiple of 128 output columns ----
    zp = _round_up(max(z_dim, 128), 128)
    w3p = jnp.pad(w3, ((0, 0), (0, zp - z_dim)))
    b3p = jnp.pad(b3, ((0, 0), (0, zp - z_dim)))

    # ---- row tiling: large TM (feeds the MXU M dim), pad N to a multiple of TM ----
    tm = min(tm_max, _round_up(N, 8))
    n_pad = _round_up(N, tm)
    if n_pad != N:
        x2d = jnp.pad(x2d, ((0, n_pad - N), (0, 0)))
    grid = (n_pad // tm,)

    # ---- right-sized VMEM budget: double-buffered x tile + out tile + weights ----
    tile_bytes = 4 * (2 * tm * seqlen + 2 * tm * zp
                      + seqlen * hid + hid * hid + hid * zp + 2 * hid + zp)
    vmem_limit = int(min(max(2 * tile_bytes, 16 << 20), 48 << 20))

    const = lambda shape: pl.BlockSpec(shape, lambda i: (0, 0))

    y = pl.pallas_call(
        _mlp_encoder_kernel,
        out_shape=jax.ShapeDtypeStruct((n_pad, zp), jnp.float32),
        grid=grid,
        in_specs=[
            pl.BlockSpec((tm, seqlen), lambda i: (i, 0)),  # x: tiled over rows
            const((seqlen, hid)),                          # w1 (VMEM-resident)
            const((1, hid)),                               # b1
            const((hid, hid)),                             # w2
            const((1, hid)),                               # b2
            const((hid, zp)),                              # w3 (padded to 128 cols)
            const((1, zp)),                                # b3 (padded)
        ],
        out_specs=pl.BlockSpec((tm, zp), lambda i: (i, 0)),
        compiler_params=pltpu.CompilerParams(
            dimension_semantics=("parallel",),
            vmem_limit_bytes=vmem_limit,
        ),
    )(x2d, w1, b1, w2, b2, w3p, b3p)

    return y[:N, :z_dim]


def baseline_encoder_forward(x, params):
    """x: [..., seqlen] (e.g. [batch, inp_dim, seqlen]) -> [..., z_dim]."""
    w1, b1, w2, b2, w3, b3 = params
    lead = x.shape[:-1]
    seqlen = x.shape[-1]
    x2d = x.reshape(-1, seqlen)
    y2d = mlp_encoder(x2d, w1, b1, w2, b2, w3, b3)
    return y2d.reshape(*lead, w3.shape[1])


def init_params(key, seqlen, z_dim, hid=64):
    """Deterministic PyTorch-style init: U(-1/sqrt(fan_in), 1/sqrt(fan_in))."""
    ks = jax.random.split(key, 6)

    def lin(kw, kb, fan_in, fan_out):
        bound = 1.0 / jnp.sqrt(fan_in)
        w = jax.random.uniform(kw, (fan_in, fan_out), jnp.float32, -bound, bound)
        b = jax.random.uniform(kb, (1, fan_out), jnp.float32, -bound, bound)
        return w, b

    w1, b1 = lin(ks[0], ks[1], seqlen, hid)
    w2, b2 = lin(ks[2], ks[3], hid, hid)
    w3, b3 = lin(ks[4], ks[5], hid, z_dim)
    return (w1, b1, w2, b2, w3, b3)


if __name__ == "__main__":
    # Small, module-consistent shapes (PyTorch default is inp_dim=1, z_dim=8).
    batch, inp_dim, seqlen, z_dim = 2, 1, 256, 8

    key = jax.random.PRNGKey(0)
    k_x, k_p = jax.random.split(key)
    x = jax.random.normal(k_x, (batch, inp_dim, seqlen), dtype=jnp.float32)
    params = init_params(k_p, seqlen, z_dim)

    y = baseline_encoder_forward(x, params)
    jax.block_until_ready(y)

    # pure-JAX reference check (f32 throughout, tight tolerance)
    w1, b1, w2, b2, w3, b3 = params
    h = jnp.maximum(x.reshape(-1, seqlen) @ w1 + b1, 0.0)
    h = jnp.maximum(h @ w2 + b2, 0.0)
    y_ref = (h @ w3 + b3).reshape(batch, inp_dim, z_dim)
    assert y.shape == (batch, inp_dim, z_dim)
    assert jnp.allclose(y, y_ref, atol=1e-5, rtol=1e-5)

    # TODO(synk): optional bf16 cast of x/weights (keep f32 accumulation) would halve
    # HBM traffic on the mem-bound roofline but loosens tolerance to ~1e-2.

    print("KERNEL_OK")
</pallas_src>

<mosaic_0001>
module attributes {stable_mosaic.version = 11 : i64} {
  func.func @_mlp_encoder_kernel(%arg0: i32, %arg1: memref<8x256xf32, #tpu.memory_space<vmem>>, %arg2: memref<256x64xf32, #tpu.memory_space<vmem>>, %arg3: memref<1x64xf32, #tpu.memory_space<vmem>>, %arg4: memref<64x64xf32, #tpu.memory_space<vmem>>, %arg5: memref<1x64xf32, #tpu.memory_space<vmem>>, %arg6: memref<64x128xf32, #tpu.memory_space<vmem>>, %arg7: memref<1x128xf32, #tpu.memory_space<vmem>>, %arg8: memref<8x128xf32, #tpu.memory_space<vmem>>) attributes {dimension_semantics = [#tpu.dimension_semantics<parallel>], iteration_bounds = array<i64: 1>, scalar_prefetch = 0 : i64, scratch_operands = 0 : i64, tpu.core_type = #tpu.core_type<tc>, window_params = [{transform_indices = @transform_0, window_bounds = array<i64: 8, 256>}, {pipeline_mode = #tpu.pipeline_mode<synchronous>, transform_indices = @transform_1, window_bounds = array<i64: 256, 64>}, {pipeline_mode = #tpu.pipeline_mode<synchronous>, transform_indices = @transform_2, window_bounds = array<i64: 1, 64>}, {pipeline_mode = #tpu.pipeline_mode<synchronous>, transform_indices = @transform_3, window_bounds = array<i64: 64, 64>}, {pipeline_mode = #tpu.pipeline_mode<synchronous>, transform_indices = @transform_4, window_bounds = array<i64: 1, 64>}, {pipeline_mode = #tpu.pipeline_mode<synchronous>, transform_indices = @transform_5, window_bounds = array<i64: 64, 128>}, {pipeline_mode = #tpu.pipeline_mode<synchronous>, transform_indices = @transform_6, window_bounds = array<i64: 1, 128>}, {transform_indices = @transform_7, window_bounds = array<i64: 8, 128>}]} {
    %c0 = arith.constant 0 : index
    %c0_0 = arith.constant 0 : index
    %0 = vector.load %arg1[%c0, %c0_0] : memref<8x256xf32, #tpu.memory_space<vmem>>, vector<8x256xf32>
    %c0_1 = arith.constant 0 : index
    %c0_2 = arith.constant 0 : index
    %1 = vector.load %arg2[%c0_1, %c0_2] : memref<256x64xf32, #tpu.memory_space<vmem>>, vector<256x64xf32>
    %cst = arith.constant dense<0.000000e+00> : vector<8x64xf32>
    %2 = tpu.matmul %0, %1, %cst {dimension_numbers = #tpu.dot_dimension_numbers<[1], [0], [0], [1], [0, 0, 1, 1], [], []>} : vector<8x256xf32>, vector<256x64xf32>, vector<8x64xf32> -> vector<8x64xf32>
    %c0_3 = arith.constant 0 : index
    %c0_4 = arith.constant 0 : index
    %3 = vector.load %arg3[%c0_3, %c0_4] : memref<1x64xf32, #tpu.memory_space<vmem>>, vector<1x64xf32>
    %4 = vector.broadcast %3 : vector<1x64xf32> to vector<8x64xf32>
    %5 = arith.addf %2, %4 : vector<8x64xf32>
    %cst_5 = arith.constant 0.000000e+00 : f32
    %6 = vector.broadcast %cst_5 : f32 to vector<8x64xf32>
    %7 = arith.maximumf %5, %6 : vector<8x64xf32>
    %c0_6 = arith.constant 0 : index
    %c0_7 = arith.constant 0 : index
    %8 = vector.load %arg4[%c0_6, %c0_7] : memref<64x64xf32, #tpu.memory_space<vmem>>, vector<64x64xf32>
    %cst_8 = arith.constant dense<0.000000e+00> : vector<8x64xf32>
    %9 = tpu.matmul %7, %8, %cst_8 {dimension_numbers = #tpu.dot_dimension_numbers<[1], [0], [0], [1], [0, 0, 1, 1], [], []>} : vector<8x64xf32>, vector<64x64xf32>, vector<8x64xf32> -> vector<8x64xf32>
    %c0_9 = arith.constant 0 : index
    %c0_10 = arith.constant 0 : index
    %10 = vector.load %arg5[%c0_9, %c0_10] : memref<1x64xf32, #tpu.memory_space<vmem>>, vector<1x64xf32>
    %11 = vector.broadcast %10 : vector<1x64xf32> to vector<8x64xf32>
    %12 = arith.addf %9, %11 : vector<8x64xf32>
    %cst_11 = arith.constant 0.000000e+00 : f32
    %13 = vector.broadcast %cst_11 : f32 to vector<8x64xf32>
    %14 = arith.maximumf %12, %13 : vector<8x64xf32>
    %c0_12 = arith.constant 0 : index
    %c0_13 = arith.constant 0 : index
    %15 = vector.load %arg6[%c0_12, %c0_13] : memref<64x128xf32, #tpu.memory_space<vmem>>, vector<64x128xf32>
    %cst_14 = arith.constant dense<0.000000e+00> : vector<8x128xf32>
    %16 = tpu.matmul %14, %15, %cst_14 {dimension_numbers = #tpu.dot_dimension_numbers<[1], [0], [0], [1], [0, 0, 1, 1], [], []>} : vector<8x64xf32>, vector<64x128xf32>, vector<8x128xf32> -> vector<8x128xf32>
    %c0_15 = arith.constant 0 : index
    %c0_16 = arith.constant 0 : index
    %17 = vector.load %arg7[%c0_15, %c0_16] : memref<1x128xf32, #tpu.memory_space<vmem>>, vector<1x128xf32>
    %18 = vector.broadcast %17 : vector<1x128xf32> to vector<8x128xf32>
    %19 = arith.addf %16, %18 : vector<8x128xf32>
    %c0_17 = arith.constant 0 : index
    %c0_18 = arith.constant 0 : index
    %20 = vector.load %arg8[%c0_17, %c0_18] : memref<8x128xf32, #tpu.memory_space<vmem>>, vector<8x128xf32>
    tpu.vector_store %arg8[%c0_17, %c0_18], %19 {strides = array<i32>} : memref<8x128xf32, #tpu.memory_space<vmem>>, vector<8x128xf32>,
    return
  }
  func.func @transform_0(%arg0: i32) -> (i32, i32) {
    %c0_i32 = arith.constant 0 : i32
    %c0_i32_0 = arith.constant 0 : i32
    return %arg0, %c0_i32 : i32, i32
  }
  func.func @transform_1(%arg0: i32) -> (i32, i32) {
    %c0_i32 = arith.constant 0 : i32
    %c0_i32_0 = arith.constant 0 : i32
    %c0_i32_1 = arith.constant 0 : i32
    return %c0_i32, %c0_i32_0 : i32, i32
  }
  func.func @transform_2(%arg0: i32) -> (i32, i32) {
    %c0_i32 = arith.constant 0 : i32
    %c0_i32_0 = arith.constant 0 : i32
    %c0_i32_1 = arith.constant 0 : i32
    return %c0_i32, %c0_i32_0 : i32, i32
  }
  func.func @transform_3(%arg0: i32) -> (i32, i32) {
    %c0_i32 = arith.constant 0 : i32
    %c0_i32_0 = arith.constant 0 : i32
    %c0_i32_1 = arith.constant 0 : i32
    return %c0_i32, %c0_i32_0 : i32, i32
  }
  func.func @transform_4(%arg0: i32) -> (i32, i32) {
    %c0_i32 = arith.constant 0 : i32
    %c0_i32_0 = arith.constant 0 : i32
    %c0_i32_1 = arith.constant 0 : i32
    return %c0_i32, %c0_i32_0 : i32, i32
  }
  func.func @transform_5(%arg0: i32) -> (i32, i32) {
    %c0_i32 = arith.constant 0 : i32
    %c0_i32_0 = arith.constant 0 : i32
    %c0_i32_1 = arith.constant 0 : i32
    return %c0_i32, %c0_i32_0 : i32, i32
  }
  func.func @transform_6(%arg0: i32) -> (i32, i32) {
    %c0_i32 = arith.constant 0 : i32
    %c0_i32_0 = arith.constant 0 : i32
    %c0_i32_1 = arith.constant 0 : i32
    return %c0_i32, %c0_i32_0 : i32, i32
  }
  func.func @transform_7(%arg0: i32) -> (i32, i32) {
    %c0_i32 = arith.constant 0 : i32
    %c0_i32_0 = arith.constant 0 : i32
    return %arg0, %c0_i32 : i32, i32
  }
}

</mosaic_0001>

<bundles_post_ra>
// kernel: tpu_custom_call.1
= control target key start
LH: loop header
LB: loop body
LE: loop exit
PB: predicated region body
PF: predicated region fallthrough
CT: control target
= control target key end

     0   :  { %v453_v4 = vmov 0.0   ;;  %s678_s0 = inlined_call_operand.vmem [shape: f32[8,256], index: 0, kind: input, shape index: {}]   ;;  %s679_s1 = inlined_call_operand.vmem [shape: f32[256,64], index: 1, kind: input, shape index: {}]   ;;  %s680_s2 = inlined_call_operand.vmem [shape: f32[1,64], index: 2, kind: input, shape index: {}]   ;;  %s681_s3 = inlined_call_operand.vmem [shape: f32[64,64], index: 3, kind: input, shape index: {}]   ;;  %s682_s4 = inlined_call_operand.vmem [shape: f32[1,64], index: 4, kind: input, shape index: {}]   ;;  %s683_s5 = inlined_call_operand.vmem [shape: f32[64,128], index: 5, kind: input, shape index: {}]   ;;  %s684_s6 = inlined_call_operand.vmem [shape: f32[1,128], index: 6, kind: input, shape index: {}]   ;;  %s685_s7 = inlined_call_operand.hbm [shape: f32[8,128], index: 7, kind: output, shape index: {}]  }
   0x1   :  { %v60_v0 = vld [vmem:[%s679_s1 + $0xf8] sm:$0xff]  ;;  %v59_v2 = vld [vmem:[%s679_s1 + $0xf0] sm:$0xff]  ;;  %390 = vmatprep.subr.mxu1 %v453_v4  ;;  %v58_v5 = vld [vmem:[%s679_s1 + $0xe8] sm:$0xff] }
   0x2   :  { %v44_v1 = vld [vmem:[%s679_s1 + $0x78] sm:$0xff]  ;;  %337 = vmatprep.subr.mxu0 %v60_v0  ;;  %v43_v3 = vld [vmem:[%s679_s1 + $0x70] sm:$0xff]  ;;  %v42_v6 = vld [vmem:[%s679_s1 + $0x68] sm:$0xff] }
   0x3   :  { %338 = vmatpush3.msra.mxu0 %v44_v1  ;;  %v57_v7 = vld [vmem:[%s679_s1 + $0xe0] sm:$0xff]  ;;  %v56_v9 = vld [vmem:[%s679_s1 + $0xd8] sm:$0xff]  ;;  %v55_v11 = vld [vmem:[%s679_s1 + $0xd0] sm:$0xff] }
   0x4   :  { %339 = vmatprep.subr.mxu0 %v59_v2  ;;  %v41_v8 = vld [vmem:[%s679_s1 + $0x60] sm:$0xff]  ;;  %v40_v10 = vld [vmem:[%s679_s1 + $0x58] sm:$0xff]  ;;  %v39_v12 = vld [vmem:[%s679_s1 + $0x50] sm:$0xff] }
   0x5   :  { %340 = vmatpush3.msra.mxu0 %v43_v3  ;;  %v54_v13 = vld [vmem:[%s679_s1 + $0xc8] sm:$0xff]  ;;  %v146_v16 = vld [vmem:[%s681_s3 + $0x38] sm:$0xff]  ;;  %v145_v17 = vld [vmem:[%s681_s3 + $0x30] sm:$0xff] }
   0x6   :  { %341 = vmatprep.subr.mxu0 %v58_v5  ;;  %v28_v14 = vld [vmem:[%s678_s0 + $0x8] sm:$0xff]  ;;  %v53_v18 = vld [vmem:[%s679_s1 + $0xc0] sm:$0xff]  ;;  %391 = vmatpush3.msra.mxu1 %v146_v16 }
   0x7   :  { %342 = vmatpush3.msra.mxu0 %v42_v6  ;;  %v38_v15 = vld [vmem:[%s679_s1 + $0x48] sm:$0xff]  ;;  %132 = vmatprep.mubr.f32.mxu0 %v28_v14 }
   0x8   :  { %343 = vmatprep.subr.mxu0 %v57_v7 }
   0x9   :  { %344 = vmatpush3.msra.mxu0 %v41_v8 }
   0xa   :  { %345 = vmatprep.subr.mxu0 %v56_v9 }
   0xb   :  { %346 = vmatpush3.msra.mxu0 %v40_v10 }
   0xc   :  { %347 = vmatprep.subr.mxu0 %v55_v11 }
   0xd   :  { %348 = vmatpush3.msra.mxu0 %v39_v12 }
   0xe   :  { %12 = vsyncpa [#allocation3], 0  ;;  %349 = vmatprep.subr.mxu0 %v54_v13  ;;  %v37_v19 = vld [vmem:[%s679_s1 + $0x40] sm:$0xff]  ;;  %392 = vmatprep.subr.mxu1 %v453_v4  ;;  %v144_v20 = vld [vmem:[%s681_s3 + $0x28] sm:$0xff]  ;;  %vm454_vm0 = vmmov 0   ;;  %vm154_vm1 = vcmask 523264  }
   0xf   :  { %350 = vmatpush3.msra.mxu0 %v38_v15  ;;  %v52_v21 = vld [vmem:[%s679_s1 + $0xb8] sm:$0xff]  ;;  %393 = vmatpush3.msra.mxu1 %v145_v17  ;;  %v51_v23 = vld [vmem:[%s679_s1 + $0xb0] sm:$0xff]  ;;  %v50_v25 = vld [vmem:[%s679_s1 + $0xa8] sm:$0xff]  ;;  %s455_s10 = smov [#allocation2]  }
  0x10   :  { %351 = vmatprep.subr.mxu0 %v53_v18  ;;  %v36_v22 = vld [vmem:[%s679_s1 + $0x38] sm:$0xff]  ;;  %394 = vmatprep.subr.mxu1 %v453_v4  ;;  %v35_v24 = vld [vmem:[%s679_s1 + $0x30] sm:$0xff]  ;;  %v34_v26 = vld [vmem:[%s679_s1 + $0x28] sm:$0xff] }
  0x11   :  { %352 = vmatpush3.msra.mxu0 %v37_v19  ;;  %395 = vmatpush3.msra.mxu1 %v144_v20  ;;  %v49_v27 = vld [vmem:[%s679_s1 + $0xa0] sm:$0xff]  ;;  %v48_v29 = vld [vmem:[%s679_s1 + $0x98] sm:$0xff]  ;;  %v47_v31 = vld [vmem:[%s679_s1 + $0x90] sm:$0xff] }
  0x12   :  { %353 = vmatprep.subr.mxu0 %v52_v21  ;;  %396 = vmatprep.subr.mxu1 %v453_v4  ;;  %v33_v28 = vld [vmem:[%s679_s1 + $0x20] sm:$0xff]  ;;  %v32_v30 = vld [vmem:[%s679_s1 + $0x18] sm:$0xff]  ;;  %v31_v32 = vld [vmem:[%s679_s1 + $0x10] sm:$0xff] }
  0x13   :  { %354 = vmatpush3.msra.mxu0 %v36_v22  ;;  %v46_v33 = vld [vmem:[%s679_s1 + $0x88] sm:$0xff]  ;;  %v45_v35 = vld [vmem:[%s679_s1 + $0x80] sm:$0xff]  ;;  %v142_v39 = vld [vmem:[%s681_s3 + $0x18] sm:$0xff]  ;;  %406 = vmatprep.mubr.msk.f32.mxu1 %vm454_vm0, %v453_v4 }
  0x14   :  { %355 = vmatprep.subr.mxu0 %v51_v23  ;;  %v30_v34 = vld [vmem:[%s679_s1 + $0x8] sm:$0xff]  ;;  %v29_v36 = vld [vmem:[%s679_s1] sm:$0xff]  ;;  %v141_v40 = vld [vmem:[%s681_s3 + $0x10] sm:$0xff] }
  0x15   :  { %356 = vmatpush3.msra.mxu0 %v35_v24  ;;  %v27_v37 = vld [vmem:[%s678_s0] sm:$0xff]  ;;  %v140_v41 = vld [vmem:[%s681_s3 + $0x8] sm:$0xff]  ;;  %v236_v49 = vld [vmem:[%s683_s5 + $0x38] sm:$0xff]  ;;  %s324_s0 = sshll.u32 %s455_s10, 4  ;;  %s325_s0 = int_to_ptr.vmem [resolvable:$true] %s324_s0 }
  0x16   :  { %357 = vmatprep.subr.mxu0 %v50_v25  ;;  %v143_v38 = vld [vmem:[%s681_s3 + $0x20] sm:$0xff]  ;;  %v235_v50 = vld [vmem:[%s683_s5 + $0x30] sm:$0xff]  ;;  %v234_v51 = vld [vmem:[%s683_s5 + $0x28] sm:$0xff]  ;;  %p436_p1 = scmp.lt.s32.totalorder %s325_s0, %s325_s0 }
  0x17   :  { %358 = vmatpush3.msra.mxu0 %v34_v26  ;;  %397 = vmatpush3.msra.mxu1 %v143_v38  ;;  %v139_v42 = vld [vmem:[%s681_s3] sm:$0xff]  ;;  %v232_v53 = vld [vmem:[%s683_s5 + $0x18] sm:$0xff]  ;;  %v231_v54 = vld [vmem:[%s683_s5 + $0x10] sm:$0xff] }
  0x18   :  { %359 = vmatprep.subr.mxu0 %v49_v27  ;;  %398 = vmatprep.subr.mxu1 %v453_v4  ;;  %v332_v44 = vld [vmem:[%s680_s2] ss:$0 sm:$0xff]  ;;  %v230_v55 = vld [vmem:[%s683_s5 + $0x8] sm:$0xff] }
  0x19   :  { %360 = vmatpush3.msra.mxu0 %v33_v28  ;;  %399 = vmatpush3.msra.mxu1 %v142_v39  ;;  %v233_v52 = vld [vmem:[%s683_s5 + $0x20] sm:$0xff] }
  0x1a   :  { %361 = vmatprep.subr.mxu0 %v48_v29  ;;  %400 = vmatprep.subr.mxu1 %v453_v4  ;;  %v229_v56 = vld [vmem:[%s683_s5] sm:$0xff]  ;;  %s431_s5 = scalar_lea.vmem %s325_s0, 128 }
  0x1b   :  { %362 = vmatpush3.msra.mxu0 %v32_v30  ;;  %401 = vmatpush3.msra.mxu1 %v141_v40  ;;  %v333_v57 = vld [vmem:[%s682_s4] ss:$0 sm:$0xff]  ;;  %p432_p0 = scmp.ne.s32.totalorder %s325_s0, %s431_s5  ;;  %p437_p2 = scmp.lt.s32.totalorder %s431_s5, %s431_s5 }
  0x1c   :  { %363 = vmatprep.subr.mxu0 %v47_v31  ;;  %402 = vmatprep.subr.mxu1 %v453_v4  ;;  %v335_v62 = vld [vmem:[%s684_s6] ss:$0 sm:$0xff] }
  0x1d   :  { %364 = vmatpush3.msra.mxu0 %v31_v32  ;;  %403 = vmatpush3.msra.mxu1 %v140_v41  ;;  %p438_p3 = por %p437_p2, %p436_p1 }
  0x1e   :  { %365 = vmatprep.subr.mxu0 %v46_v33  ;;  %404 = vmatprep.subr.mxu1 %v453_v4 }
  0x1f   :  { %366 = vmatpush3.msra.mxu0 %v30_v34  ;;  %405 = vmatpush3.msra.mxu1 %v139_v42  ;;  %p439_p4 = pnand %p438_p3, %p432_p0 }
  0x20   :  { %367 = vmatprep.subr.mxu0 %v45_v35  ;;  %409 = vmatprep.subr.mxu1 %v453_v4 }
  0x21   :  { %368 = vmatpush3.msra.mxu0 %v29_v36 }
  0x22   :  { %133 = vmatmul.mubr.f32.vlgmr.msra.gmra.mxu0 %v27_v37 }
  0xe2   :  { %v369_v43 = vpop.f32.mrf.mxu0 }
  0xe4   :  { %v370_v45 = vpop.f32.mrf.mxu0 }
  0xe5   :  { %v371_v46 = vadd.f32 %v370_v45, %v369_v43 }
  0xe7   :  { %v135_v47 = vadd.f32 %v371_v46, %v332_v44 }
  0xe9   :  { %v138_v48 = vmax.f32 %v135_v47, 0.0 }
  0xeb   :  { %407 = vmatmul.mubr.msk.f32.vlgmr.msra.gmra.mxu1 %vm154_vm1, %v138_v48 }
  0xec   :  { %410 = vmatpush3.msra.mxu1 %v236_v49  ;;  %425 = vmatprep.mubr.msk.f32.mxu1 %vm454_vm0, %v453_v4 }
  0xed   :  { %411 = vmatprep.subr.mxu1 %v453_v4 }
  0xee   :  { %412 = vmatpush3.msra.mxu1 %v235_v50 }
  0xef   :  { %413 = vmatprep.subr.mxu1 %v453_v4 }
  0xf0   :  { %414 = vmatpush3.msra.mxu1 %v234_v51 }
  0xf1   :  { %415 = vmatprep.subr.mxu1 %v453_v4 }
  0xf2   :  { %416 = vmatpush3.msra.mxu1 %v233_v52 }
  0xf3   :  { %417 = vmatprep.subr.mxu1 %v453_v4 }
  0xf4   :  { %418 = vmatpush3.msra.mxu1 %v232_v53 }
  0xf5   :  { %419 = vmatprep.subr.mxu1 %v453_v4 }
  0xf6   :  { %420 = vmatpush3.msra.mxu1 %v231_v54 }
  0xf7   :  { %421 = vmatprep.subr.mxu1 %v453_v4 }
  0xf8   :  { %422 = vmatpush3.msra.mxu1 %v230_v55 }
  0xf9   :  { %423 = vmatprep.subr.mxu1 %v453_v4 }
  0xfa   :  { %424 = vmatpush3.msra.mxu1 %v229_v56 }
 0x1ab   :  { %v224_v58 = vpop.f32.mrf.mxu1 }
 0x1ac   :  { %v225_v59 = vadd.f32 %v333_v57, %v224_v58 }
 0x1ad   :  { %v408_v60 = vpop.f32.mrf.mxu1 }
 0x1ae   :  { %v228_v61 = vmax.f32 %v225_v59, 0.0 }
 0x1b0   :  { %426 = vmatmul.mubr.msk.f32.vlgmr.msra.gmra.mxu1 %vm154_vm1, %v228_v61 }
 0x270   :  { %v313_v63 = vpop.f32.mrf.mxu1 }
 0x271   :  { %v314_v0 = vadd.f32 %v335_v62, %v313_v63 }
 0x272   :  { %v427_v1 = vpop.f32.mrf.mxu1 }
 0x273   :  { %317 = vst [vmem:[#allocation2] sm:$0xff] %v314_v0 }
 0x274   :  { %442 = shalt.err (!%p439_p4)
}
 0x275   :  { %327 = dma.vmem_to_hbm [thread:$0]  %s325_s0, 128, %s685_s7, [#allocation3]  }
 0x276   :  { %451 = dma.done.wait [#allocation3], 128  }
 0x277   :  { %452 = vsyncadd [#allocation3], 4294967168 }
 0x278   :  { %331 = vsyncpa [#allocation3], 1 }

</bundles_post_ra>
